<compile_context>
chip_gen: v6e
topology: v6e:2x2x1
jax: 0.10.0
libtpu: 0.0.40
codegen_flags: <defaults>
</compile_context>

<pallas_src>
import functools

import jax
import jax.numpy as jnp
import numpy as np
from jax.experimental import pallas as pl
from jax.experimental.pallas import tpu as pltpu


def _rnn_kernel(x_ref, w_ref, b_ref, fcw_ref, fcb_ref, out_ref):
    """x_ref: (TB, P) input (zero-padded to P = max(D, H)).
       w_ref: (L, P, H) stacked, padded input->hidden weights (pre-transposed).
       b_ref: (L, 1, H) folded biases (b_ih + b_hh).
       fcw_ref: (H, O_pad) fc weight (pre-transposed, zero-padded lanes).
       fcb_ref: (1, O_pad) fc bias (-1e30 in padded lanes).
       out_ref: (TB, O_pad) softmax output (padded lanes are exactly 0)."""
    num_layers, P, H = w_ref.shape
    inp = x_ref[...].astype(jnp.float32)                        # (TB, P)

    # Unrolled layer stack; hidden-to-hidden matmuls are dropped (h0 == 0, T == 1).
    for l in range(num_layers):
        pre = jnp.dot(inp, w_ref[l], preferred_element_type=jnp.float32) + b_ref[l]
        h = jnp.tanh(pre)                                       # (TB, H)
        if l + 1 < num_layers and P > H:                        # only if D > H (static)
            h = jnp.pad(h, ((0, 0), (0, P - H)))
        inp = h

    # fc + softmax over the (lane-padded) output dim.
    logits = jnp.dot(inp, fcw_ref[...], preferred_element_type=jnp.float32) + fcb_ref[...]
    m = jnp.max(logits, axis=-1, keepdims=True)
    e = jnp.exp(logits - m)                                     # padded cols -> exactly 0
    inv = pl.reciprocal(jnp.sum(e, axis=-1, keepdims=True), approx=True)
    out_ref[...] = (e * inv).astype(out_ref.dtype)


def init_params(key, input_dim, hidden_dim, layer_dim, output_dim):
    """Deterministic init mimicking PyTorch's U(-1/sqrt(H), 1/sqrt(H)) for all params."""
    params = {}
    bound = 1.0 / np.sqrt(hidden_dim)
    keys = jax.random.split(key, 4 * layer_dim + 2)
    k = 0
    for l in range(layer_dim):
        in_dim = input_dim if l == 0 else hidden_dim
        params[f"w_ih_{l}"] = jax.random.uniform(keys[k], (hidden_dim, in_dim),
                                                 jnp.float32, -bound, bound); k += 1
        params[f"w_hh_{l}"] = jax.random.uniform(keys[k], (hidden_dim, hidden_dim),
                                                 jnp.float32, -bound, bound); k += 1
        params[f"b_ih_{l}"] = jax.random.uniform(keys[k], (hidden_dim,),
                                                 jnp.float32, -bound, bound); k += 1
        params[f"b_hh_{l}"] = jax.random.uniform(keys[k], (hidden_dim,),
                                                 jnp.float32, -bound, bound); k += 1
    params["fc_w"] = jax.random.uniform(keys[k], (output_dim, hidden_dim),
                                        jnp.float32, -bound, bound); k += 1
    params["fc_b"] = jax.random.uniform(keys[k], (output_dim,),
                                        jnp.float32, -bound, bound)
    return params


def rnn_model_forward(x, params, layer_dim):
    """Pallas implementation of RNNModel.forward. x: (B, T, D) float32, T must be 1."""
    B, T, D = x.shape
    if T != 1:
        raise ValueError("RNNModel.forward's final reshape(B, O) requires seq_len == 1")
    H = params["w_hh_0"].shape[0]
    O = params["fc_w"].shape[0]
    P = max(D, H)                                   # common padded input width per layer
    O_pad = int(pl.cdiv(O, 128)) * 128              # lane-dense output width

    # Stack + fuse parameters (tiny one-time prep outside the kernel).
    w_list, b_list = [], []
    for l in range(layer_dim):
        w = params[f"w_ih_{l}"].T                   # (D_in_l, H)
        if w.shape[0] < P:
            w = jnp.pad(w, ((0, P - w.shape[0]), (0, 0)))
        w_list.append(w)
        b_list.append((params[f"b_ih_{l}"] + params[f"b_hh_{l}"]).reshape(1, H))
    w_stack = jnp.stack(w_list, axis=0).astype(jnp.float32)     # (L, P, H)
    b_stack = jnp.stack(b_list, axis=0).astype(jnp.float32)     # (L, 1, H)

    fc_wT = params["fc_w"].T.astype(jnp.float32)                # (H, O)
    fc_b = params["fc_b"].reshape(1, O).astype(jnp.float32)     # (1, O)
    if O_pad != O:
        fc_wT = jnp.pad(fc_wT, ((0, 0), (0, O_pad - O)))
        # padded logits get a huge negative bias -> softmax weight underflows to exactly 0
        fc_b = jnp.pad(fc_b, ((0, 0), (0, O_pad - O)), constant_values=-1e30)

    x2 = x.reshape(B, D).astype(jnp.float32)                    # T == 1 -> drop time axis
    if P != D:
        x2 = jnp.pad(x2, ((0, 0), (0, P - D)))                  # padded cols hit zero weight rows

    tile_b = min(B, 128)
    grid = (int(pl.cdiv(B, tile_b)),)

    out = pl.pallas_call(
        _rnn_kernel,
        out_shape=jax.ShapeDtypeStruct((B, O_pad), jnp.float32),
        grid=grid,
        in_specs=[
            pl.BlockSpec((tile_b, P), lambda i: (i, 0)),            # x (batch-tiled)
            pl.BlockSpec((layer_dim, P, H), lambda i: (0, 0, 0)),   # stacked w_ih^T
            pl.BlockSpec((layer_dim, 1, H), lambda i: (0, 0, 0)),   # folded biases
            pl.BlockSpec((H, O_pad), lambda i: (0, 0)),             # fc_w^T (lane-padded)
            pl.BlockSpec((1, O_pad), lambda i: (0, 0)),             # fc_b (lane-padded)
        ],
        out_specs=pl.BlockSpec((tile_b, O_pad), lambda i: (i, 0)),
        compiler_params=pltpu.CompilerParams(
            dimension_semantics=("parallel",)),
    )(x2, w_stack, b_stack, fc_wT, fc_b)

    # Matches torch: out.reshape(out.shape[0], out.shape[2]) for T == 1.
    return out[:, :O]


def rnn_model_reference(x, params, layer_dim):
    """Pure-JAX reference (keeps the full recurrence incl. w_hh/b_hh and h0 = 0)."""
    B, T, D = x.shape
    H = params["w_hh_0"].shape[0]
    h = [jnp.zeros((B, H), jnp.float32) for _ in range(layer_dim)]
    outs = []
    for t in range(T):
        inp = x[:, t, :]
        for l in range(layer_dim):
            pre = (inp @ params[f"w_ih_{l}"].T + params[f"b_ih_{l}"]
                   + h[l] @ params[f"w_hh_{l}"].T + params[f"b_hh_{l}"])
            h[l] = jnp.tanh(pre)
            inp = h[l]
        logits = inp @ params["fc_w"].T + params["fc_b"]
        outs.append(jax.nn.softmax(logits, axis=-1))
    out = jnp.stack(outs, axis=1)                 # (B, T, O)
    return out.reshape(B, out.shape[2])


if __name__ == "__main__":
    # Small shapes consistent with the module; T must be 1 (required by the original reshape).
    B, T = 2, 1
    input_dim, hidden_dim, layer_dim, output_dim = 16, 32, 2, 8

    key = jax.random.PRNGKey(0)
    kx, kp = jax.random.split(key)
    x = jax.random.normal(kx, (B, T, input_dim), jnp.float32)
    params = init_params(kp, input_dim, hidden_dim, layer_dim, output_dim)

    y = jax.block_until_ready(rnn_model_forward(x, params, layer_dim))
    y_ref = rnn_model_reference(x, params, layer_dim)

    # Tolerance relaxed for pl.reciprocal(approx=True) in the softmax (~1e-3 relative).
    np.testing.assert_allclose(np.asarray(y), np.asarray(y_ref), rtol=2e-3, atol=2e-3)

    print("KERNEL_OK")
</pallas_src>

<mosaic_0001>
module attributes {stable_mosaic.version = 11 : i64} {
  func.func @_rnn_kernel(%arg0: i32, %arg1: memref<2x32xf32, #tpu.memory_space<vmem>>, %arg2: memref<2x32x32xf32, #tpu.memory_space<vmem>>, %arg3: memref<2x1x32xf32, #tpu.memory_space<vmem>>, %arg4: memref<32x128xf32, #tpu.memory_space<vmem>>, %arg5: memref<1x128xf32, #tpu.memory_space<vmem>>, %arg6: memref<2x128xf32, #tpu.memory_space<vmem>>) attributes {dimension_semantics = [#tpu.dimension_semantics<parallel>], iteration_bounds = array<i64: 1>, scalar_prefetch = 0 : i64, scratch_operands = 0 : i64, tpu.core_type = #tpu.core_type<tc>, window_params = [{transform_indices = @transform_0, window_bounds = array<i64: 2, 32>}, {pipeline_mode = #tpu.pipeline_mode<synchronous>, transform_indices = @transform_1, window_bounds = array<i64: 2, 32, 32>}, {pipeline_mode = #tpu.pipeline_mode<synchronous>, transform_indices = @transform_2, window_bounds = array<i64: 2, 1, 32>}, {pipeline_mode = #tpu.pipeline_mode<synchronous>, transform_indices = @transform_3, window_bounds = array<i64: 32, 128>}, {pipeline_mode = #tpu.pipeline_mode<synchronous>, transform_indices = @transform_4, window_bounds = array<i64: 1, 128>}, {transform_indices = @transform_5, window_bounds = array<i64: 2, 128>}]} {
    %c0 = arith.constant 0 : index
    %c0_0 = arith.constant 0 : index
    %0 = vector.load %arg1[%c0, %c0_0] : memref<2x32xf32, #tpu.memory_space<vmem>>, vector<2x32xf32>
    %c0_1 = arith.constant 0 : index
    %c0_2 = arith.constant 0 : index
    %c0_3 = arith.constant 0 : index
    %1 = vector.load %arg2[%c0_1, %c0_2, %c0_3] : memref<2x32x32xf32, #tpu.memory_space<vmem>>, vector<1x32x32xf32>
    %2 = vector.shape_cast %1 : vector<1x32x32xf32> to vector<32x32xf32>
    %cst = arith.constant dense<0.000000e+00> : vector<2x32xf32>
    %3 = tpu.matmul %0, %2, %cst {dimension_numbers = #tpu.dot_dimension_numbers<[1], [0], [0], [1], [0, 0, 1, 1], [], []>} : vector<2x32xf32>, vector<32x32xf32>, vector<2x32xf32> -> vector<2x32xf32>
    %c0_4 = arith.constant 0 : index
    %c0_5 = arith.constant 0 : index
    %c0_6 = arith.constant 0 : index
    %4 = vector.load %arg3[%c0_4, %c0_5, %c0_6] : memref<2x1x32xf32, #tpu.memory_space<vmem>>, vector<1x1x32xf32>
    %5 = vector.shape_cast %4 : vector<1x1x32xf32> to vector<1x32xf32>
    %6 = vector.broadcast %5 : vector<1x32xf32> to vector<2x32xf32>
    %7 = arith.addf %3, %6 : vector<2x32xf32>
    %8 = math.tanh %7 : vector<2x32xf32>
    %c1 = arith.constant 1 : index
    %c0_7 = arith.constant 0 : index
    %c0_8 = arith.constant 0 : index
    %9 = vector.load %arg2[%c1, %c0_7, %c0_8] : memref<2x32x32xf32, #tpu.memory_space<vmem>>, vector<1x32x32xf32>
    %10 = vector.shape_cast %9 : vector<1x32x32xf32> to vector<32x32xf32>
    %cst_9 = arith.constant dense<0.000000e+00> : vector<2x32xf32>
    %11 = tpu.matmul %8, %10, %cst_9 {dimension_numbers = #tpu.dot_dimension_numbers<[1], [0], [0], [1], [0, 0, 1, 1], [], []>} : vector<2x32xf32>, vector<32x32xf32>, vector<2x32xf32> -> vector<2x32xf32>
    %c1_10 = arith.constant 1 : index
    %c0_11 = arith.constant 0 : index
    %c0_12 = arith.constant 0 : index
    %12 = vector.load %arg3[%c1_10, %c0_11, %c0_12] : memref<2x1x32xf32, #tpu.memory_space<vmem>>, vector<1x1x32xf32>
    %13 = vector.shape_cast %12 : vector<1x1x32xf32> to vector<1x32xf32>
    %14 = vector.broadcast %13 : vector<1x32xf32> to vector<2x32xf32>
    %15 = arith.addf %11, %14 : vector<2x32xf32>
    %16 = math.tanh %15 : vector<2x32xf32>
    %c0_13 = arith.constant 0 : index
    %c0_14 = arith.constant 0 : index
    %17 = vector.load %arg4[%c0_13, %c0_14] : memref<32x128xf32, #tpu.memory_space<vmem>>, vector<32x128xf32>
    %cst_15 = arith.constant dense<0.000000e+00> : vector<2x128xf32>
    %18 = tpu.matmul %16, %17, %cst_15 {dimension_numbers = #tpu.dot_dimension_numbers<[1], [0], [0], [1], [0, 0, 1, 1], [], []>} : vector<2x32xf32>, vector<32x128xf32>, vector<2x128xf32> -> vector<2x128xf32>
    %c0_16 = arith.constant 0 : index
    %c0_17 = arith.constant 0 : index
    %19 = vector.load %arg5[%c0_16, %c0_17] : memref<1x128xf32, #tpu.memory_space<vmem>>, vector<1x128xf32>
    %20 = vector.broadcast %19 : vector<1x128xf32> to vector<2x128xf32>
    %21 = arith.addf %18, %20 : vector<2x128xf32>
    %cst_18 = arith.constant dense<0xFF800000> : vector<2xf32>
    %22 = vector.multi_reduction <maximumf>, %21, %cst_18 [1] : vector<2x128xf32> to vector<2xf32>
    %23 = vector.shape_cast %22 : vector<2xf32> to vector<2x1xf32>
    %24 = vector.broadcast %23 : vector<2x1xf32> to vector<2x128xf32>
    %25 = arith.subf %21, %24 : vector<2x128xf32>
    %26 = math.exp %25 : vector<2x128xf32>
    %cst_19 = arith.constant dense<0.000000e+00> : vector<2xf32>
    %27 = vector.multi_reduction <add>, %26, %cst_19 [1] : vector<2x128xf32> to vector<2xf32>
    %28 = vector.shape_cast %27 : vector<2xf32> to vector<2x1xf32>
    %29 = tpu.reciprocal %28 {approx = true} : vector<2x1xf32> -> vector<2x1xf32>
    %30 = vector.broadcast %29 : vector<2x1xf32> to vector<2x128xf32>
    %31 = arith.mulf %26, %30 : vector<2x128xf32>
    %c0_20 = arith.constant 0 : index
    %c0_21 = arith.constant 0 : index
    %32 = vector.load %arg6[%c0_20, %c0_21] : memref<2x128xf32, #tpu.memory_space<vmem>>, vector<2x128xf32>
    tpu.vector_store %arg6[%c0_20, %c0_21], %31 {strides = array<i32>} : memref<2x128xf32, #tpu.memory_space<vmem>>, vector<2x128xf32>,
    return
  }
  func.func @transform_0(%arg0: i32) -> (i32, i32) {
    %c0_i32 = arith.constant 0 : i32
    %c0_i32_0 = arith.constant 0 : i32
    return %arg0, %c0_i32 : i32, i32
  }
  func.func @transform_1(%arg0: i32) -> (i32, i32, i32) {
    %c0_i32 = arith.constant 0 : i32
    %c0_i32_0 = arith.constant 0 : i32
    %c0_i32_1 = arith.constant 0 : i32
    %c0_i32_2 = arith.constant 0 : i32
    return %c0_i32, %c0_i32_0, %c0_i32_1 : i32, i32, i32
  }
  func.func @transform_2(%arg0: i32) -> (i32, i32, i32) {
    %c0_i32 = arith.constant 0 : i32
    %c0_i32_0 = arith.constant 0 : i32
    %c0_i32_1 = arith.constant 0 : i32
    %c0_i32_2 = arith.constant 0 : i32
    return %c0_i32, %c0_i32_0, %c0_i32_1 : i32, i32, i32
  }
  func.func @transform_3(%arg0: i32) -> (i32, i32) {
    %c0_i32 = arith.constant 0 : i32
    %c0_i32_0 = arith.constant 0 : i32
    %c0_i32_1 = arith.constant 0 : i32
    return %c0_i32, %c0_i32_0 : i32, i32
  }
  func.func @transform_4(%arg0: i32) -> (i32, i32) {
    %c0_i32 = arith.constant 0 : i32
    %c0_i32_0 = arith.constant 0 : i32
    %c0_i32_1 = arith.constant 0 : i32
    return %c0_i32, %c0_i32_0 : i32, i32
  }
  func.func @transform_5(%arg0: i32) -> (i32, i32) {
    %c0_i32 = arith.constant 0 : i32
    %c0_i32_0 = arith.constant 0 : i32
    return %arg0, %c0_i32 : i32, i32
  }
}

</mosaic_0001>

<bundles_post_ra>
// kernel: tpu_custom_call.1
= control target key start
LH: loop header
LB: loop body
LE: loop exit
PB: predicated region body
PF: predicated region fallthrough
CT: control target
= control target key end

     0   :  { %10 = vsyncpa [#allocation3], 0  ;;  %s569_s0 = inlined_call_operand.hbm [shape: f32[2,32], index: 0, kind: input, shape index: {}]   ;;  %s570_s1 = inlined_call_operand.hbm [shape: f32[2,32,32], index: 1, kind: input, shape index: {}]   ;;  %s571_s2 = inlined_call_operand.vmem [shape: f32[2,1,32], index: 2, kind: input, shape index: {}]   ;;  %s572_s3 = inlined_call_operand.hbm [shape: f32[32,128], index: 3, kind: input, shape index: {}]   ;;  %s573_s4 = inlined_call_operand.vmem [shape: f32[1,128], index: 4, kind: input, shape index: {}]   ;;  %s574_s5 = inlined_call_operand.hbm [shape: f32[2,128], index: 5, kind: output, shape index: {}]  }
   0x1   :  { %11 = vsyncpa [#allocation6], 0 }
   0x2   :  { %12 = vsyncpa [#allocation4], 0  ;;  %s504_s18 = smov [#allocation5]  }
   0x3   :  { %s28_s19 = sshll.u32 %s504_s18, 4  ;;  %s29_s19 = int_to_ptr.vmem [resolvable:$true] %s28_s19 }
   0x4   :  { %s426_s20 = scalar_lea.vmem %s29_s19, 1024  ;;  %p431_p1 = scmp.lt.s32.totalorder %s29_s19, %s29_s19 }
   0x5   :  { %p427_p0 = scmp.ne.s32.totalorder %s29_s19, %s426_s20  ;;  %p432_p2 = scmp.lt.s32.totalorder %s426_s20, %s426_s20 }
   0x7   :  { %p433_p3 = por %p432_p2, %p431_p1 }
   0x9   :  { %p434_p4 = pnand %p433_p3, %p427_p0 }
   0xb   :  { %437 = shalt.err (!%p434_p4)
}
   0xc   :  { %s505_s21 = smov 128   ;;  %s506_s22 = smov 8  }
   0xd   :  { %34 = dma.hbm_to_vmem [thread:$0]  %s570_s1, 1024, %s29_s19, [#allocation6], %s505_s21, %s505_s21, %s506_s22  }
   0xe   :  { %s507_s25 = smov [#allocation2]   ;;  %s508_s27 = smov [#allocation7]  }
   0xf   :  { %s19_s26 = sshll.u32 %s507_s25, 4  ;;  %s42_s28 = sshll.u32 %s508_s27, 4  ;;  %s20_s26 = int_to_ptr.vmem [resolvable:$true] %s19_s26  ;;  %s43_s28 = int_to_ptr.vmem [resolvable:$true] %s42_s28 }
  0x10   :  { %s446_s29 = scalar_lea.vmem %s20_s26, 32  ;;  %p451_p6 = scmp.lt.s32.totalorder %s20_s26, %s20_s26 }
  0x11   :  { %p447_p5 = scmp.ne.s32.totalorder %s20_s26, %s446_s29  ;;  %p452_p7 = scmp.lt.s32.totalorder %s446_s29, %s446_s29 }
  0x13   :  { %p453_p8 = por %p452_p7, %p451_p6 }
  0x15   :  { %p454_p9 = pnand %p453_p8, %p447_p5 }
  0x17   :  { %457 = shalt.err (!%p454_p9)
}
  0x18   :  { %22 = dma.hbm_to_vmem [thread:$0]  %s569_s0, 32, %s20_s26, [#allocation3]  }
  0x19   :  { %s466_s7 = scalar_lea.vmem %s43_s28, 512  ;;  %p471_p11 = scmp.lt.s32.totalorder %s43_s28, %s43_s28 }
  0x1a   :  { %p467_p10 = scmp.ne.s32.totalorder %s43_s28, %s466_s7  ;;  %p472_p12 = scmp.lt.s32.totalorder %s466_s7, %s466_s7 }
  0x1c   :  { %p473_p13 = por %p472_p12, %p471_p11 }
  0x1e   :  { %p474_p0 = pnand %p473_p13, %p467_p10 }
  0x20   :  { %477 = shalt.err (!%p474_p0)
}
  0x21   :  { %48 = dma.hbm_to_vmem [thread:$0]  %s572_s3, 512, %s43_s28, [#allocation6], %s505_s21, %s505_s21, %s506_s22  }
  0x22   :  { %498 = dma.done.wait [#allocation3], 32  }
  0x23   :  { %499 = vsyncadd [#allocation3], 4294967264 }
  0x24   :  { %500 = dma.done.wait [#allocation6], 1536  }
  0x25   :  { %501 = vsyncadd [#allocation6], 4294965760  ;;  %v509_v0 = vmov 0.0   ;;  %vm510_vm0 = vmmov 0   ;;  %v64_v1 = vld [vmem:[#allocation5 + $0x18] sm:$0xff]  ;;  %v63_v2 = vld [vmem:[#allocation5 + $0x10] sm:$0xff] }
  0x26   :  { %369 = vmatprep.subr.mxu0 %v509_v0  ;;  %377 = vmatprep.mubr.msk.f32.mxu0 %vm510_vm0, %v509_v0  ;;  %v62_v3 = vld [vmem:[#allocation5 + $0x8] sm:$0xff]  ;;  %v61_v4 = vld [vmem:[#allocation5] sm:$0xff]  ;;  %v60_v5 = vld [vmem:[#allocation2] sm:$0x3]  ;;  %vm72_vm1 = vcmask 261120   ;;  %vm318_vm2 = vcmask 1041408  }
  0x27   :  { %380 = vmatprep.subr.mxu1 %v509_v0  ;;  %388 = vmatprep.mubr.msk.f32.mxu1 %vm510_vm0, %v509_v0  ;;  %v151_v6 = vld [vmem:[#allocation5 + $0x38] sm:$0xff]  ;;  %v150_v7 = vld [vmem:[#allocation5 + $0x30] sm:$0xff]  ;;  %v149_v8 = vld [vmem:[#allocation5 + $0x28] sm:$0xff] }
  0x28   :  { %370 = vmatpush3.msra.mxu0 %v64_v1  ;;  %381 = vmatpush3.msra.mxu1 %v151_v6  ;;  %v148_v9 = vld [vmem:[#allocation5 + $0x20] sm:$0xff]  ;;  %v347_v10 = vld [vmem:[%s571_s2] ss:$0 sm:$0xff]  ;;  %v236_v16 = vld [vmem:[#allocation7 + $0x10] sm:$0xff] }
  0x29   :  { %371 = vmatprep.subr.mxu0 %v509_v0  ;;  %382 = vmatprep.subr.mxu1 %v509_v0  ;;  %v237_v15 = vld [vmem:[#allocation7 + $0x18] sm:$0xff]  ;;  %v235_v17 = vld [vmem:[#allocation7 + $0x8] sm:$0xff]  ;;  %v234_v18 = vld [vmem:[#allocation7] sm:$0xff] }
  0x2a   :  { %372 = vmatpush3.msra.mxu0 %v63_v2  ;;  %383 = vmatpush3.msra.mxu1 %v150_v7  ;;  %v350_v19 = vld [vmem:[%s571_s2 + $0x1] ss:$0 sm:$0xff]  ;;  %v352_v24 = vld [vmem:[%s573_s4] ss:$0 sm:$0xff]  ;;  %s511_s2 = smov [#allocation8]  }
  0x2b   :  { %373 = vmatprep.subr.mxu0 %v509_v0  ;;  %384 = vmatprep.subr.mxu1 %v509_v0  ;;  %s337_s13 = sshll.u32 %s511_s2, 4  ;;  %s338_s13 = int_to_ptr.vmem [resolvable:$true] %s337_s13 }
  0x2c   :  { %374 = vmatpush3.msra.mxu0 %v62_v3  ;;  %385 = vmatpush3.msra.mxu1 %v149_v8  ;;  %s478_s4 = scalar_lea.vmem %s338_s13, 32  ;;  %p483_p2 = scmp.lt.s32.totalorder %s338_s13, %s338_s13 }
  0x2d   :  { %375 = vmatprep.subr.mxu0 %v509_v0  ;;  %386 = vmatprep.subr.mxu1 %v509_v0  ;;  %p479_p1 = scmp.ne.s32.totalorder %s338_s13, %s478_s4  ;;  %p484_p3 = scmp.lt.s32.totalorder %s478_s4, %s478_s4 }
  0x2e   :  { %376 = vmatpush3.msra.mxu0 %v61_v4  ;;  %387 = vmatpush3.msra.mxu1 %v148_v9 }
  0x2f   :  { %378 = vmatmul.mubr.msk.f32.vlgmr.msra.gmra.mxu0 %vm72_vm1, %v60_v5  ;;  %391 = vmatprep.subr.mxu0 %v509_v0  ;;  %p485_p4 = por %p484_p3, %p483_p2 }
  0x30   :  { %399 = vmatprep.mubr.msk.f32.mxu0 %vm510_vm0, %v509_v0  ;;  %392 = vmatpush3.msra.mxu0 %v237_v15 }
  0x31   :  { %393 = vmatprep.subr.mxu0 %v509_v0  ;;  %p486_p5 = pnand %p485_p4, %p479_p1 }
  0x32   :  { %394 = vmatpush3.msra.mxu0 %v236_v16 }
  0x33   :  { %395 = vmatprep.subr.mxu0 %v509_v0 }
  0x34   :  { %396 = vmatpush3.msra.mxu0 %v235_v17 }
  0x35   :  { %397 = vmatprep.subr.mxu0 %v509_v0 }
  0x36   :  { %398 = vmatpush3.msra.mxu0 %v234_v18 }
  0xef   :  { %v142_v11 = vpop.f32.mrf.mxu0 }
  0xf0   :  { %v143_v12 = vadd.f32 %v347_v10, %v142_v11 }
  0xf1   :  { %v379_v13 = vpop.f32.mrf.mxu0 }
  0xf2   :  { %410 = vtanh.f32 %v143_v12 }
  0xff   :  { %v411_v14 = vpop.eup %410 }
 0x100   :  { %389 = vmatmul.mubr.msk.f32.vlgmr.msra.gmra.mxu1 %vm72_vm1, %v411_v14 }
 0x1c0   :  { %v229_v20 = vpop.f32.mrf.mxu1 }
 0x1c1   :  { %v230_v21 = vadd.f32 %v350_v19, %v229_v20 }
 0x1c2   :  { %v390_v22 = vpop.f32.mrf.mxu1 }
 0x1c3   :  { %412 = vtanh.f32 %v230_v21 }
 0x1d0   :  { %v413_v23 = vpop.eup %412 }
 0x1d1   :  { %400 = vmatmul.mubr.msk.f32.vlgmr.msra.gmra.mxu0 %vm72_vm1, %v413_v23 }
 0x291   :  { %v314_v25 = vpop.f32.mrf.mxu0 }
 0x292   :  { %v315_v26 = vadd.f32 %v352_v24, %v314_v25 }
 0x293   :  { %v401_v27 = vpop.f32.mrf.mxu0 }
 0x294   :  { %v319_v28 = vsel %vm318_vm2, %v315_v26, -inf }
 0x295   :  { %320 = vmax.xlane.f32.xlu0 %v319_v28 }
 0x31e   :  { %v321_v29 = vpop.xlane.xlu0 %320 }
 0x31f   :  { %v322_v30 = vsub.f32 %v315_v26, %v321_v29 }
 0x321   :  { %v323_v31 = vmul.f32 1.442695, %v322_v30 }
 0x323   :  { %414 = vpow2.f32 %v323_v31 }
 0x330   :  { %v415_v32 = vpop.eup %414 }
 0x331   :  { %v325_v33 = vsel %vm318_vm2, %v415_v32, 0.0 }
 0x332   :  { %326 = vadd.xlane.f32.xlu0 %v325_v33 }
 0x3bb   :  { %v327_v34 = vpop.xlane.xlu0 %326 }
 0x3bc   :  { %416 = vrcp.f32 %v327_v34 }
 0x3c9   :  { %v417_v35 = vpop.eup %416 }
 0x3ca   :  { %v329_v36 = vmul.f32 %v417_v35, %v415_v32 }
 0x3cc   :  { %330 = vst [vmem:[#allocation8] sm:$0x3] %v329_v36 }
 0x3cd   :  { %489 = shalt.err (!%p486_p5)
}
 0x3ce   :  { %340 = dma.vmem_to_hbm [thread:$0]  %s338_s13, 32, %s574_s5, [#allocation4]  }
 0x3cf   :  { %502 = dma.done.wait [#allocation4], 32  }
 0x3d0   :  { %503 = vsyncadd [#allocation4], 4294967264 }
 0x3d1   :  { %344 = vsyncpa [#allocation3], 1 }
 0x3d2   :  { %345 = vsyncpa [#allocation6], 1 }
 0x3d3   :  { %346 = vsyncpa [#allocation4], 1 }

</bundles_post_ra>
